<compile_context>
chip_gen: v5e
topology: v5e:2x2
jax: 0.10.0
libtpu: 0.0.40
codegen_flags: <defaults>
</compile_context>

<pallas_src>
import jax
import jax.numpy as jnp
from jax.experimental import pallas as pl
from jax.experimental.pallas import tpu as pltpu

CONTEXT_SIZE = 2
EMBEDDING_DIM = 20
HIDDEN = 300

test_sentence = 'In my dual profession as an educator and health care provider, I have worked with numerous children infected with the virus that causes AIDS. The relationships that I have had with these special kids have been gifts in my life. They have taught me so many things, but I have especially learned that great courage can be found in the smallest of packages. Let me tell you about Tyler.\n\nTyler was born infected with HIV: his mother was also infected. From the very beginning of his life, he was dependent on medications to enable him to survive. When he was five, he had a tube surgically inserted in a vein in his chest. This tube was connected to a pump, which he carried in a small backpack on his back. Medications were hooked up to this pump and were continuously supplied through this tube to his bloodstream. At times, he also needed supplemented oxygen to support his breathing.\n\nTyler wasn’t willing to give up one single moment of his childhood to this deadly disease. It was not unusual to find him playing and racing around his backyard, wearing his medicine-laden backpack and dragging his tank of oxygen behind him in his little wagon. All of us who knew Tyler marveled at his pure joy in being alive and the energy it gave him. Tyler’s mom often teased him by telling him that he moved so fast she needed to dress him in red. That way, when she peered through the window to check on him playing in the yard, she could quickly spot him.\n\nThis dreaded disease eventually wore down even the likes of a little dynamo like Tyler. He grew quite ill and, unfortunately, so did his HIV-infected mother. When it became apparent that he wasn’t going to survive, Tyler’s mom talked to him about death. She comforted him by telling Tyler that she was dying too, and that she would be with him soon in heaven.\n\nA few days before his death, Tyler beckoned me over to his hospital bed and whispered, “I might die soon. I’m not scared. When I die, please dress me in red. Mom promised she’s coming to heaven, too. I’ll be playing when she gets there, and I want to make sure she can find me.”'.split()

vocb = set(test_sentence)
vocb_size = len(vocb)


def _round_up(n, m):
    return ((n + m - 1) // m) * m


HIDDEN_PAD = _round_up(HIDDEN, 128)        # 300 -> 384 (lane-dense hidden)
V_PAD = _round_up(vocb_size, 128)          # vocab -> next multiple of 128
IN_DIM = CONTEXT_SIZE * EMBEDDING_DIM      # 40


def ngram_kernel(x_ref, w1_ref, b1_ref, w2_ref, b2_ref, out_ref):
    """Single-program 2-layer MLP kernel, everything resident in VMEM.

    x_ref  : VMEM f32 (B_pad, IN_DIM)        pre-gathered, concatenated embeddings
    w1_ref : VMEM f32 (IN_DIM, HIDDEN_PAD)
    b1_ref : VMEM f32 (1, HIDDEN_PAD)
    w2_ref : VMEM f32 (HIDDEN_PAD, V_PAD)
    b2_ref : VMEM f32 (1, V_PAD)
    out_ref: VMEM f32 (B_pad, V_PAD)         padded logits (lane-dense store)
    """
    h = jnp.dot(x_ref[...], w1_ref[...], preferred_element_type=jnp.float32)
    h = jnp.maximum(h + b1_ref[...], 0.0)          # bias + ReLU (Dropout = identity)
    out_ref[...] = (
        jnp.dot(h, w2_ref[...], preferred_element_type=jnp.float32) + b2_ref[...]
    )


@jax.jit
def ngram_forward(idx, emb, w1, b1, w2, b2):
    """Forward pass.

    idx: int32 (CONTEXT_SIZE,) or (B, CONTEXT_SIZE).
    Returns logits of shape (B, vocb_size) (B = 1 for a 1-D idx, matching the
    PyTorch module's (1, V) output).
    """
    if idx.ndim == 1:
        idx = idx[None, :]
    B = idx.shape[0]
    V = emb.shape[0]

    # Bounds-safe gather + concat in the wrapper: only 2*B embedding rows are
    # read, and the kernel gets a dense (B, 40) activation.
    idx = jnp.clip(idx, 0, V - 1)
    x = jnp.take(emb, idx, axis=0).reshape(B, IN_DIM)

    # Pad to TPU-friendly shapes: batch to a sublane multiple (>= 8),
    # hidden/vocab to lane multiples (128).  Zero padding keeps numerics exact.
    # (In a real deployment the weight padding would be done once at init.)
    B_pad = _round_up(max(B, 8), 8)
    x_p = jnp.pad(x, ((0, B_pad - B), (0, 0)))
    w1_p = jnp.pad(w1, ((0, 0), (0, HIDDEN_PAD - HIDDEN)))
    b1_p = jnp.pad(b1, ((0, 0), (0, HIDDEN_PAD - HIDDEN)))
    w2_p = jnp.pad(w2, ((0, HIDDEN_PAD - HIDDEN), (0, V_PAD - V)))
    b2_p = jnp.pad(b2, ((0, 0), (0, V_PAD - V)))

    out = pl.pallas_call(
        ngram_kernel,
        out_shape=jax.ShapeDtypeStruct((B_pad, V_PAD), jnp.float32),
        in_specs=[
            pl.BlockSpec(memory_space=pltpu.MemorySpace.VMEM),   # x
            pl.BlockSpec(memory_space=pltpu.MemorySpace.VMEM),   # W1
            pl.BlockSpec(memory_space=pltpu.MemorySpace.VMEM),   # b1
            pl.BlockSpec(memory_space=pltpu.MemorySpace.VMEM),   # W2
            pl.BlockSpec(memory_space=pltpu.MemorySpace.VMEM),   # b2
        ],
        out_specs=pl.BlockSpec(memory_space=pltpu.MemorySpace.VMEM),
    )(x_p, w1_p, b1_p, w2_p, b2_p)

    return out[:B, :V]


def reference_forward(idx, emb, w1, b1, w2, b2):
    if idx.ndim == 1:
        idx = idx[None, :]
    x = emb[idx].reshape(idx.shape[0], -1)          # (B, CONTEXT_SIZE*EMBEDDING_DIM)
    h = jnp.maximum(x @ w1 + b1, 0.0)               # (B, HIDDEN)
    return h @ w2 + b2                              # (B, V)


if __name__ == "__main__":
    key = jax.random.PRNGKey(0)
    k_emb, k_w1, k_b1, k_w2, k_b2, k_idx, k_idx_b = jax.random.split(key, 7)

    # Deterministic parameter init (matches PyTorch init *distributions*, not values):
    emb = jax.random.normal(k_emb, (vocb_size, EMBEDDING_DIM), dtype=jnp.float32)
    lim1 = 1.0 / jnp.sqrt(IN_DIM)
    w1 = jax.random.uniform(k_w1, (IN_DIM, HIDDEN), minval=-lim1, maxval=lim1, dtype=jnp.float32)
    b1 = jax.random.uniform(k_b1, (1, HIDDEN), minval=-lim1, maxval=lim1, dtype=jnp.float32)
    lim2 = 1.0 / jnp.sqrt(HIDDEN)
    w2 = jax.random.uniform(k_w2, (HIDDEN, vocb_size), minval=-lim2, maxval=lim2, dtype=jnp.float32)
    b2 = jax.random.uniform(k_b2, (1, vocb_size), minval=-lim2, maxval=lim2, dtype=jnp.float32)

    # Case 1: single context (exact PyTorch-module semantics, output (1, V)).
    idx = jax.random.randint(k_idx, (CONTEXT_SIZE,), 0, vocb_size, dtype=jnp.int32)
    out = jax.block_until_ready(ngram_forward(idx, emb, w1, b1, w2, b2))
    ref = reference_forward(idx, emb, w1, b1, w2, b2)
    assert out.shape == (1, vocb_size), out.shape
    assert jnp.allclose(out, ref, atol=1e-4, rtol=1e-4), "single-context mismatch vs JAX reference"

    # Case 2: small batch of contexts (B=4) through the same kernel.
    idx_b = jax.random.randint(k_idx_b, (4, CONTEXT_SIZE), 0, vocb_size, dtype=jnp.int32)
    out_b = jax.block_until_ready(ngram_forward(idx_b, emb, w1, b1, w2, b2))
    ref_b = reference_forward(idx_b, emb, w1, b1, w2, b2)
    assert out_b.shape == (4, vocb_size), out_b.shape
    assert jnp.allclose(out_b, ref_b, atol=1e-4, rtol=1e-4), "batched mismatch vs JAX reference"

    print("KERNEL_OK")
</pallas_src>

<mosaic_0001>
module attributes {stable_mosaic.version = 11 : i64} {
  func.func @ngram_kernel(%arg0: memref<8x40xf32, #tpu.memory_space<vmem>>, %arg1: memref<40x384xf32, #tpu.memory_space<vmem>>, %arg2: memref<1x384xf32, #tpu.memory_space<vmem>>, %arg3: memref<384x256xf32, #tpu.memory_space<vmem>>, %arg4: memref<1x256xf32, #tpu.memory_space<vmem>>, %arg5: memref<8x256xf32, #tpu.memory_space<vmem>>) attributes {dimension_semantics = [], scalar_prefetch = 0 : i64, scratch_operands = 0 : i64, tpu.core_type = #tpu.core_type<tc>} {
    %c0 = arith.constant 0 : index
    %c0_0 = arith.constant 0 : index
    %0 = vector.load %arg0[%c0, %c0_0] : memref<8x40xf32, #tpu.memory_space<vmem>>, vector<8x40xf32>
    %c0_1 = arith.constant 0 : index
    %c0_2 = arith.constant 0 : index
    %1 = vector.load %arg1[%c0_1, %c0_2] : memref<40x384xf32, #tpu.memory_space<vmem>>, vector<40x384xf32>
    %cst = arith.constant dense<0.000000e+00> : vector<8x384xf32>
    %2 = tpu.matmul %0, %1, %cst {dimension_numbers = #tpu.dot_dimension_numbers<[1], [0], [0], [1], [0, 0, 1, 1], [], []>} : vector<8x40xf32>, vector<40x384xf32>, vector<8x384xf32> -> vector<8x384xf32>
    %c0_3 = arith.constant 0 : index
    %c0_4 = arith.constant 0 : index
    %3 = vector.load %arg2[%c0_3, %c0_4] : memref<1x384xf32, #tpu.memory_space<vmem>>, vector<1x384xf32>
    %4 = vector.broadcast %3 : vector<1x384xf32> to vector<8x384xf32>
    %5 = arith.addf %2, %4 : vector<8x384xf32>
    %cst_5 = arith.constant 0.000000e+00 : f32
    %6 = vector.broadcast %cst_5 : f32 to vector<8x384xf32>
    %7 = arith.maximumf %5, %6 : vector<8x384xf32>
    %c0_6 = arith.constant 0 : index
    %c0_7 = arith.constant 0 : index
    %8 = vector.load %arg3[%c0_6, %c0_7] : memref<384x256xf32, #tpu.memory_space<vmem>>, vector<384x256xf32>
    %cst_8 = arith.constant dense<0.000000e+00> : vector<8x256xf32>
    %9 = tpu.matmul %7, %8, %cst_8 {dimension_numbers = #tpu.dot_dimension_numbers<[1], [0], [0], [1], [0, 0, 1, 1], [], []>} : vector<8x384xf32>, vector<384x256xf32>, vector<8x256xf32> -> vector<8x256xf32>
    %c0_9 = arith.constant 0 : index
    %c0_10 = arith.constant 0 : index
    %10 = vector.load %arg4[%c0_9, %c0_10] : memref<1x256xf32, #tpu.memory_space<vmem>>, vector<1x256xf32>
    %11 = vector.broadcast %10 : vector<1x256xf32> to vector<8x256xf32>
    %12 = arith.addf %9, %11 : vector<8x256xf32>
    %c0_11 = arith.constant 0 : index
    %c0_12 = arith.constant 0 : index
    %13 = vector.load %arg5[%c0_11, %c0_12] : memref<8x256xf32, #tpu.memory_space<vmem>>, vector<8x256xf32>
    tpu.vector_store %arg5[%c0_11, %c0_12], %12 {strides = array<i32>} : memref<8x256xf32, #tpu.memory_space<vmem>>, vector<8x256xf32>,
    return
  }
}

</mosaic_0001>

<bundles_post_ra>
// kernel: ngram_forward.1
= control target key start
LH: loop header
LB: loop body
LE: loop exit
PB: predicated region body
PF: predicated region fallthrough
CT: control target
= control target key end

     0   :  { %vm44_vm0 = vcmask 326656   ;;  %s723_s1 = inlined_call_operand.vmem [shape: f32[40,384], index: 1, kind: input, shape index: {}]   ;;  %s724_s3 = inlined_call_operand.vmem [shape: f32[384,256], index: 3, kind: input, shape index: {}]   ;;  %s725_s0 = inlined_call_operand.vmem [shape: f32[8,40], index: 0, kind: input, shape index: {}]   ;;  %s726_s2 = inlined_call_operand.vmem [shape: f32[1,384], index: 2, kind: input, shape index: {}]   ;;  %s727_s4 = inlined_call_operand.vmem [shape: f32[1,256], index: 4, kind: input, shape index: {}]   ;;  %s728_s5 = inlined_call_operand.vmem [shape: f32[8,256], index: 5, kind: output, shape index: {}]  }
   0x1   :  { %v33_v0 = vld [vmem:[%s723_s1 + $0x60] sm:$0xff]  ;;  %v30_v1 = vld [vmem:[%s723_s1 + $0x48] sm:$0xff]  ;;  %v35_v2 = vld [vmem:[%s723_s1 + $0x70] sm:$0xff] }
   0x2   :  { %59 = vmatpush.msra.mxu1 %v33_v0  ;;  %v32_v3 = vld [vmem:[%s723_s1 + $0x58] sm:$0xff]  ;;  %v27_v4 = vld [vmem:[%s723_s1 + $0x30] sm:$0xff]  ;;  %99 = vmatpush.msra.mxu2 %v35_v2  ;;  %v29_v5 = vld [vmem:[%s723_s1 + $0x40] sm:$0xff] }
   0x3   :  { %v24_v6 = vld [vmem:[%s723_s1 + $0x18] sm:$0xff]  ;;  %v26_v7 = vld [vmem:[%s723_s1 + $0x28] sm:$0xff]  ;;  %v141_v8 = vld [vmem:[%s724_s3 + $0xf0] sm:$0xff] }
   0x4   :  { %60 = vmatpush.msra.mxu1 %v30_v1  ;;  %100 = vmatpush.msra.mxu2 %v32_v3  ;;  %v139_v9 = vld [vmem:[%s724_s3 + $0xe0] sm:$0xff]  ;;  %v34_v11 = vld [vmem:[%s723_s1 + $0x68] sm:$0xff]  ;;  %v23_v12 = vld [vmem:[%s723_s1 + $0x10] sm:$0xff] }
   0x5   :  { %v21_v10 = vld [vmem:[%s723_s1] sm:$0xff]  ;;  %213 = vmatpush.msra.mxu3 %v141_v8  ;;  %v173_v13 = vld [vmem:[%s724_s3 + $0x1f0] sm:$0xff]  ;;  %v28_v18 = vld [vmem:[%s723_s1 + $0x38] sm:$0xff] }
   0x6   :  { %61 = vmatpush.msra.mxu1 %v27_v4  ;;  %101 = vmatpush.msra.mxu2 %v29_v5  ;;  %v20_v14 = vld [vmem:[%s725_s0] sm:$0xff]  ;;  %v31_v15 = vld [vmem:[%s723_s1 + $0x50] sm:$0xff]  ;;  %v142_v21 = vld [vmem:[%s724_s3 + $0xf8] sm:$0xff] }
   0x7   :  { %214 = vmatpush.msra.mxu3 %v139_v9  ;;  %v137_v16 = vld [vmem:[%s724_s3 + $0xd0] sm:$0xff]  ;;  %233 = vmatpush.msra.mxu0 %v173_v13  ;;  %v171_v17 = vld [vmem:[%s724_s3 + $0x1e0] sm:$0xff]  ;;  %v140_v24 = vld [vmem:[%s724_s3 + $0xe8] sm:$0xff] }
   0x8   :  { %62 = vmatpush.msra.mxu1 %v24_v6  ;;  %102 = vmatpush.msra.mxu2 %v26_v7  ;;  %v135_v19 = vld [vmem:[%s724_s3 + $0xc0] sm:$0xff]  ;;  %v169_v20 = vld [vmem:[%s724_s3 + $0x1d0] sm:$0xff]  ;;  %v138_v26 = vld [vmem:[%s724_s3 + $0xd8] sm:$0xff] }
   0x9   :  { %215 = vmatpush.msra.mxu3 %v137_v16  ;;  %v25_v22 = vld [vmem:[%s723_s1 + $0x20] sm:$0xff]  ;;  %v133_v23 = vld [vmem:[%s724_s3 + $0xb0] sm:$0xff]  ;;  %234 = vmatpush.msra.mxu0 %v171_v17  ;;  %v22_v27 = vld [vmem:[%s723_s1 + $0x8] sm:$0xff] }
   0xa   :  { %63 = vmatpush.msra.mxu1 %v21_v10  ;;  %103 = vmatpush.msra.mxu2 %v23_v12  ;;  %v167_v25 = vld [vmem:[%s724_s3 + $0x1c0] sm:$0xff]  ;;  %v165_v29 = vld [vmem:[%s724_s3 + $0x1b0] sm:$0xff]  ;;  %v136_v31 = vld [vmem:[%s724_s3 + $0xc8] sm:$0xff] }
   0xb   :  { %339 = vmatmul.msk.f32.vlgmr.msra.gmra.mxu1 %vm44_vm0, %v20_v14  ;;  %341 = vmatmul.msk.f32.vlgmr.msra.gmra.mxu2 %vm44_vm0, %v20_v14  ;;  %v131_v28 = vld [vmem:[%s724_s3 + $0xa0] sm:$0xff]  ;;  %v129_v30 = vld [vmem:[%s724_s3 + $0x90] sm:$0xff]  ;;  %v134_v35 = vld [vmem:[%s724_s3 + $0xb8] sm:$0xff] }
   0xc   :  { %79 = vmatpush.msrb.mxu1 %v34_v11  ;;  %273 = vmatpush.msrb.mxu2 %v142_v21  ;;  %v163_v32 = vld [vmem:[%s724_s3 + $0x1a0] sm:$0xff]  ;;  %v205_v33 = vld [vmem:[%s724_s3 + $0x2f0] sm:$0xff]  ;;  %v132_v39 = vld [vmem:[%s724_s3 + $0xa8] sm:$0xff] }
   0xd   :  { %216 = vmatpush.msra.mxu3 %v135_v19  ;;  %235 = vmatpush.msra.mxu0 %v169_v20  ;;  %v127_v34 = vld [vmem:[%s724_s3 + $0x80] sm:$0xff]  ;;  %v161_v36 = vld [vmem:[%s724_s3 + $0x190] sm:$0xff]  ;;  %v130_v43 = vld [vmem:[%s724_s3 + $0x98] sm:$0xff] }
   0xe   :  { %80 = vmatpush.msrb.mxu1 %v31_v15  ;;  %274 = vmatpush.msrb.mxu2 %v140_v24  ;;  %v203_v37 = vld [vmem:[%s724_s3 + $0x2e0] sm:$0xff]  ;;  %v125_v38 = vld [vmem:[%s724_s3 + $0x70] sm:$0xff]  ;;  %v128_v47 = vld [vmem:[%s724_s3 + $0x88] sm:$0xff] }
   0xf   :  { %217 = vmatpush.msra.mxu3 %v133_v23  ;;  %236 = vmatpush.msra.mxu0 %v167_v25  ;;  %v159_v40 = vld [vmem:[%s724_s3 + $0x180] sm:$0xff]  ;;  %v201_v41 = vld [vmem:[%s724_s3 + $0x2d0] sm:$0xff]  ;;  %v126_v51 = vld [vmem:[%s724_s3 + $0x78] sm:$0xff] }
  0x10   :  { %81 = vmatpush.msrb.mxu1 %v28_v18  ;;  %275 = vmatpush.msrb.mxu2 %v138_v26  ;;  %v123_v42 = vld [vmem:[%s724_s3 + $0x60] sm:$0xff]  ;;  %v157_v44 = vld [vmem:[%s724_s3 + $0x170] sm:$0xff]  ;;  %v124_v55 = vld [vmem:[%s724_s3 + $0x68] sm:$0xff] }
  0x11   :  { %218 = vmatpush.msra.mxu3 %v131_v28  ;;  %237 = vmatpush.msra.mxu0 %v165_v29  ;;  %v199_v45 = vld [vmem:[%s724_s3 + $0x2c0] sm:$0xff]  ;;  %v121_v46 = vld [vmem:[%s724_s3 + $0x50] sm:$0xff]  ;;  %v122_v59 = vld [vmem:[%s724_s3 + $0x58] sm:$0xff] }
  0x12   :  { %82 = vmatpush.msrb.mxu1 %v25_v22  ;;  %276 = vmatpush.msrb.mxu2 %v136_v31  ;;  %v155_v48 = vld [vmem:[%s724_s3 + $0x160] sm:$0xff]  ;;  %v197_v49 = vld [vmem:[%s724_s3 + $0x2b0] sm:$0xff]  ;;  %v120_v63 = vld [vmem:[%s724_s3 + $0x48] sm:$0xff] }
  0x13   :  { %219 = vmatpush.msra.mxu3 %v129_v30  ;;  %238 = vmatpush.msra.mxu0 %v163_v32  ;;  %v119_v50 = vld [vmem:[%s724_s3 + $0x40] sm:$0xff]  ;;  %v153_v52 = vld [vmem:[%s724_s3 + $0x150] sm:$0xff]  ;;  %v118_v2 = vld [vmem:[%s724_s3 + $0x38] sm:$0xff] }
  0x14   :  { %83 = vmatpush.msrb.mxu1 %v22_v27  ;;  %277 = vmatpush.msrb.mxu2 %v134_v35  ;;  %v195_v53 = vld [vmem:[%s724_s3 + $0x2a0] sm:$0xff]  ;;  %v117_v54 = vld [vmem:[%s724_s3 + $0x30] sm:$0xff]  ;;  %v174_v3 = vld [vmem:[%s724_s3 + $0x1f8] sm:$0xff] }
  0x15   :  { %340 = vmatmul.msk.f32.vlgmr.msrb.gmra.mxu1 %vm44_vm0, %v20_v14  ;;  %220 = vmatpush.msra.mxu3 %v127_v34  ;;  %v151_v56 = vld [vmem:[%s724_s3 + $0x140] sm:$0xff]  ;;  %v193_v57 = vld [vmem:[%s724_s3 + $0x290] sm:$0xff]  ;;  %v172_v5 = vld [vmem:[%s724_s3 + $0x1e8] sm:$0xff] }
  0x16   :  { %253 = vmatpush.msra.mxu1 %v205_v33  ;;  %239 = vmatpush.msra.mxu0 %v161_v36  ;;  %v115_v58 = vld [vmem:[%s724_s3 + $0x20] sm:$0xff]  ;;  %v149_v60 = vld [vmem:[%s724_s3 + $0x130] sm:$0xff]  ;;  %v206_v7 = vld [vmem:[%s724_s3 + $0x2f8] sm:$0xff] }
  0x17   :  { %221 = vmatpush.msra.mxu3 %v125_v38  ;;  %278 = vmatpush.msrb.mxu2 %v132_v39  ;;  %v191_v61 = vld [vmem:[%s724_s3 + $0x280] sm:$0xff]  ;;  %v113_v62 = vld [vmem:[%s724_s3 + $0x10] sm:$0xff]  ;;  %v170_v8 = vld [vmem:[%s724_s3 + $0x1d8] sm:$0xff] }
  0x18   :  { %254 = vmatpush.msra.mxu1 %v203_v37  ;;  %240 = vmatpush.msra.mxu0 %v159_v40  ;;  %v147_v0 = vld [vmem:[%s724_s3 + $0x120] sm:$0xff]  ;;  %v145_v4 = vld [vmem:[%s724_s3 + $0x110] sm:$0xff]  ;;  %v204_v9 = vld [vmem:[%s724_s3 + $0x2e8] sm:$0xff] }
  0x19   :  { %222 = vmatpush.msra.mxu3 %v123_v42  ;;  %279 = vmatpush.msrb.mxu2 %v130_v43  ;;  %v111_v1 = vld [vmem:[%s724_s3] sm:$0xff]  ;;  %v168_v10 = vld [vmem:[%s724_s3 + $0x1c8] sm:$0xff]  ;;  %v202_v11 = vld [vmem:[%s724_s3 + $0x2d8] sm:$0xff] }
  0x1a   :  { %255 = vmatpush.msra.mxu1 %v201_v41  ;;  %241 = vmatpush.msra.mxu0 %v157_v44  ;;  %v143_v6 = vld [vmem:[%s724_s3 + $0x100] sm:$0xff]  ;;  %v166_v12 = vld [vmem:[%s724_s3 + $0x1b8] sm:$0xff]  ;;  %v200_v13 = vld [vmem:[%s724_s3 + $0x2c8] sm:$0xff] }
  0x1b   :  { %223 = vmatpush.msra.mxu3 %v121_v46  ;;  %280 = vmatpush.msrb.mxu2 %v128_v47  ;;  %v164_v14 = vld [vmem:[%s724_s3 + $0x1a8] sm:$0xff]  ;;  %v198_v15 = vld [vmem:[%s724_s3 + $0x2b8] sm:$0xff]  ;;  %v189_v19 = vld [vmem:[%s724_s3 + $0x270] sm:$0xff] }
  0x1c   :  { %256 = vmatpush.msra.mxu1 %v199_v45  ;;  %242 = vmatpush.msra.mxu0 %v155_v48  ;;  %v162_v16 = vld [vmem:[%s724_s3 + $0x198] sm:$0xff]  ;;  %v160_v17 = vld [vmem:[%s724_s3 + $0x188] sm:$0xff]  ;;  %v187_v23 = vld [vmem:[%s724_s3 + $0x260] sm:$0xff] }
  0x1d   :  { %224 = vmatpush.msra.mxu3 %v119_v50  ;;  %281 = vmatpush.msrb.mxu2 %v126_v51  ;;  %v158_v18 = vld [vmem:[%s724_s3 + $0x178] sm:$0xff]  ;;  %v116_v20 = vld [vmem:[%s724_s3 + $0x28] sm:$0xff]  ;;  %v185_v27 = vld [vmem:[%s724_s3 + $0x250] sm:$0xff] }
  0x1e   :  { %257 = vmatpush.msra.mxu1 %v197_v49  ;;  %243 = vmatpush.msra.mxu0 %v153_v52  ;;  %v156_v21 = vld [vmem:[%s724_s3 + $0x168] sm:$0xff]  ;;  %v114_v24 = vld [vmem:[%s724_s3 + $0x18] sm:$0xff]  ;;  %v183_v31 = vld [vmem:[%s724_s3 + $0x240] sm:$0xff] }
  0x1f   :  { %225 = vmatpush.msra.mxu3 %v117_v54  ;;  %282 = vmatpush.msrb.mxu2 %v124_v55  ;;  %v196_v22 = vld [vmem:[%s724_s3 + $0x2a8] sm:$0xff]  ;;  %v154_v25 = vld [vmem:[%s724_s3 + $0x158] sm:$0xff]  ;;  %v181_v34 = vld [vmem:[%s724_s3 + $0x230] sm:$0xff] }
  0x20   :  { %258 = vmatpush.msra.mxu1 %v195_v53  ;;  %244 = vmatpush.msra.mxu0 %v151_v56  ;;  %v194_v26 = vld [vmem:[%s724_s3 + $0x298] sm:$0xff]  ;;  %v112_v28 = vld [vmem:[%s724_s3 + $0x8] sm:$0xff]  ;;  %v179_v37 = vld [vmem:[%s724_s3 + $0x220] sm:$0xff] }
  0x21   :  { %226 = vmatpush.msra.mxu3 %v115_v58  ;;  %283 = vmatpush.msrb.mxu2 %v122_v59  ;;  %v152_v29 = vld [vmem:[%s724_s3 + $0x148] sm:$0xff]  ;;  %v150_v32 = vld [vmem:[%s724_s3 + $0x138] sm:$0xff]  ;;  %v177_v40 = vld [vmem:[%s724_s3 + $0x210] sm:$0xff] }
  0x22   :  { %259 = vmatpush.msra.mxu1 %v193_v57  ;;  %245 = vmatpush.msra.mxu0 %v149_v60  ;;  %v192_v30 = vld [vmem:[%s724_s3 + $0x288] sm:$0xff]  ;;  %v190_v33 = vld [vmem:[%s724_s3 + $0x278] sm:$0xff]  ;;  %v175_v43 = vld [vmem:[%s724_s3 + $0x200] sm:$0xff] }
  0x23   :  { %227 = vmatpush.msra.mxu3 %v113_v62  ;;  %284 = vmatpush.msrb.mxu2 %v120_v63  ;;  %v148_v35 = vld [vmem:[%s724_s3 + $0x128] sm:$0xff]  ;;  %v146_v38 = vld [vmem:[%s724_s3 + $0x118] sm:$0xff]  ;;  %v36_v48 = vld [vmem:[%s726_s2] sm:$0x7] }
  0x24   :  { %260 = vmatpush.msra.mxu1 %v191_v61  ;;  %246 = vmatpush.msra.mxu0 %v147_v0  ;;  %v188_v36 = vld [vmem:[%s724_s3 + $0x268] sm:$0xff]  ;;  %v186_v39 = vld [vmem:[%s724_s3 + $0x258] sm:$0xff]  ;;  %v38_v49 = vperm.slane %v36_v48, 0  ;;  %v40_v53 = vperm.slane %v36_v48, 2  ;;  %v39_v54 = vperm.slane %v36_v48, 1 }
  0x25   :  { %228 = vmatpush.msra.mxu3 %v111_v1  ;;  %285 = vmatpush.msrb.mxu2 %v118_v2  ;;  %v144_v41 = vld [vmem:[%s724_s3 + $0x108] sm:$0xff]  ;;  %v182_v44 = vld [vmem:[%s724_s3 + $0x238] sm:$0xff]  ;;  %v207_v61 = vld [vmem:[%s727_s4] sm:$0x3] }
  0x26   :  { %247 = vmatpush.msra.mxu0 %v145_v4  ;;  %261 = vmatpush.msra.mxu1 %v189_v19  ;;  %v184_v42 = vld [vmem:[%s724_s3 + $0x248] sm:$0xff]  ;;  %v178_v46 = vld [vmem:[%s724_s3 + $0x218] sm:$0xff]  ;;  %v209_v62 = vperm.slane %v207_v61, 0 }
  0x27   :  { %293 = vmatpush.msrb.mxu3 %v174_v3  ;;  %286 = vmatpush.msrb.mxu2 %v116_v20  ;;  %v180_v45 = vld [vmem:[%s724_s3 + $0x228] sm:$0xff]  ;;  %v210_v3 = vperm.slane %v207_v61, 1 }
  0x28   :  { %248 = vmatpush.msra.mxu0 %v143_v6  ;;  %262 = vmatpush.msra.mxu1 %v187_v23  ;;  %v176_v47 = vld [vmem:[%s724_s3 + $0x208] sm:$0xff] }
  0x29   :  { %294 = vmatpush.msrb.mxu3 %v172_v5  ;;  %287 = vmatpush.msrb.mxu2 %v114_v24 }
  0x2a   :  { %313 = vmatpush.msrb.mxu0 %v206_v7  ;;  %263 = vmatpush.msra.mxu1 %v185_v27 }
  0x2b   :  { %295 = vmatpush.msrb.mxu3 %v170_v8  ;;  %288 = vmatpush.msrb.mxu2 %v112_v28 }
  0x2c   :  { %314 = vmatpush.msrb.mxu0 %v204_v9  ;;  %264 = vmatpush.msra.mxu1 %v183_v31 }
  0x2d   :  { %296 = vmatpush.msrb.mxu3 %v168_v10 }
  0x2e   :  { %315 = vmatpush.msrb.mxu0 %v202_v11  ;;  %265 = vmatpush.msra.mxu1 %v181_v34 }
  0x2f   :  { %297 = vmatpush.msrb.mxu3 %v166_v12 }
  0x30   :  { %316 = vmatpush.msrb.mxu0 %v200_v13  ;;  %266 = vmatpush.msra.mxu1 %v179_v37 }
  0x31   :  { %298 = vmatpush.msrb.mxu3 %v164_v14 }
  0x32   :  { %317 = vmatpush.msrb.mxu0 %v198_v15  ;;  %267 = vmatpush.msra.mxu1 %v177_v40 }
  0x33   :  { %299 = vmatpush.msrb.mxu3 %v162_v16 }
  0x34   :  { %318 = vmatpush.msrb.mxu0 %v196_v22  ;;  %268 = vmatpush.msra.mxu1 %v175_v43 }
  0x35   :  { %300 = vmatpush.msrb.mxu3 %v160_v17 }
  0x36   :  { %319 = vmatpush.msrb.mxu0 %v194_v26 }
  0x37   :  { %301 = vmatpush.msrb.mxu3 %v158_v18 }
  0x38   :  { %320 = vmatpush.msrb.mxu0 %v192_v30 }
  0x39   :  { %302 = vmatpush.msrb.mxu3 %v156_v21 }
  0x3a   :  { %321 = vmatpush.msrb.mxu0 %v190_v33 }
  0x3b   :  { %303 = vmatpush.msrb.mxu3 %v154_v25 }
  0x3c   :  { %322 = vmatpush.msrb.mxu0 %v188_v36 }
  0x3d   :  { %304 = vmatpush.msrb.mxu3 %v152_v29 }
  0x3e   :  { %323 = vmatpush.msrb.mxu0 %v186_v39 }
  0x3f   :  { %305 = vmatpush.msrb.mxu3 %v150_v32 }
  0x40   :  { %324 = vmatpush.msrb.mxu0 %v184_v42 }
  0x41   :  { %306 = vmatpush.msrb.mxu3 %v148_v35 }
  0x42   :  { %325 = vmatpush.msrb.mxu0 %v182_v44 }
  0x43   :  { %307 = vmatpush.msrb.mxu3 %v146_v38 }
  0x44   :  { %326 = vmatpush.msrb.mxu0 %v180_v45 }
  0x45   :  { %308 = vmatpush.msrb.mxu3 %v144_v41 }
  0x46   :  { %327 = vmatpush.msrb.mxu0 %v178_v46 }
  0x48   :  { %328 = vmatpush.msrb.mxu0 %v176_v47 }
  0x88   :  { %v65_v50 = vpop.f32.mrf.mxu1 }
  0x89   :  { %v66_v51 = vadd.f32 %v65_v50, %v38_v49 }
  0x8b   :  { %v108_v52 = vmax.f32 %v66_v51, 0.0 }
  0x8d   :  { %229 = vmatmul.f32.vlgmr.msra.gmra.mxu3 %v108_v52  ;;  %289 = vmatmul.f32.vlgmr.msrb.gmra.mxu2 %v108_v52 }
  0x8e   :  { %v105_v55 = vpop.f32.mrf.mxu2 }
  0x8f   :  { %v106_v56 = vadd.f32 %v105_v55, %v40_v53 }
  0x91   :  { %v110_v59 = vmax.f32 %v106_v56, 0.0 }
  0x92   :  { %v85_v57 = vpop.f32.mrf.mxu1 }
  0x93   :  { %v86_v58 = vadd.f32 %v85_v57, %v39_v54  ;;  %269 = vmatmul.f32.vlgmr.msra.gmra.mxu1 %v110_v59 }
  0x95   :  { %v109_v60 = vmax.f32 %v86_v58, 0.0 }
  0x97   :  { %249 = vmatmul.f32.vlgmr.msra.gmra.mxu0 %v109_v60  ;;  %309 = vmatmul.f32.vlgmr.msrb.gmra.mxu3 %v109_v60 }
  0x9f   :  { %329 = vmatmul.f32.vlgmr.msrb.gmra.mxu0 %v110_v59 }
 0x110   :  { %v230_v63 = vpop.f32.mrf.mxu3  ;;  %v270_v2 = vpop.f32.mrf.mxu1 }
 0x111   :  { %v231_v0 = vadd.f32 %v230_v63, %v209_v62  ;;  %v290_v5 = vpop.f32.mrf.mxu2 }
 0x112   :  { %v291_v7 = vadd.f32 %v290_v5, %v210_v3 }
 0x114   :  { %v250_v1 = vpop.f32.mrf.mxu0 }
 0x115   :  { %v251_v4 = vadd.f32 %v250_v1, %v231_v0 }
 0x117   :  { %v271_v6 = vadd.f32 %v270_v2, %v251_v4 }
 0x119   :  { %333 = vst [vmem:[%s728_s5] sm:$0xff] %v271_v6 }
 0x11a   :  { %v310_v8 = vpop.f32.mrf.mxu3 }
 0x11b   :  { %v311_v9 = vadd.f32 %v310_v8, %v291_v7 }
 0x11c   :  { %v330_v10 = vpop.f32.mrf.mxu0 }
 0x11d   :  { %v331_v11 = vadd.f32 %v330_v10, %v311_v9 }
 0x11f   :  { %334 = vst [vmem:[%s728_s5 + $0x8] sm:$0xff] %v331_v11 }

</bundles_post_ra>
